<compile_context>
chip_gen: v7x
topology: tpu7x:2x2x1
jax: 0.10.0
libtpu: 0.0.40
codegen_flags: <defaults>
</compile_context>

<pallas_src>
import functools

import jax
import jax.numpy as jnp
from jax.experimental import pallas as pl
from jax.experimental.pallas import tpu as pltpu

LEAKY_SLOPE = 0.01   # nn.LeakyReLU default
BN_EPS = 1e-5        # nn.BatchNorm1d default
LANE = 128
SUBLANE = 8
MAX_BATCH_TILE = 512


def _round_up(x, m):
    return (x + m - 1) // m * m


def _pad2d(a, rows, cols):
    r, c = a.shape
    return jnp.pad(a, ((0, rows - r), (0, cols - c)))


# ---------------------------------------------------------------------------
# Fused kernel: whole FC stack in one pass (BN already folded into weights)
# ---------------------------------------------------------------------------
def _fused_fc_kernel(n_hidden, x_ref, *refs):
    """refs = [w0, b0, ..., w_{n-1}, b_{n-1}, w_head, b_head, o_ref].

    All operands are lane-dense (feature dims padded to multiples of 128);
    the activation stays in vregs between layers.
    """
    o_ref = refs[-1]
    h = x_ref[...]
    for k in range(n_hidden):
        w, b = refs[2 * k], refs[2 * k + 1]
        y = jnp.dot(h, w[...], preferred_element_type=jnp.float32) + b[...]
        h = jnp.maximum(y, LEAKY_SLOPE * y)          # LeakyReLU (slope < 1)
    w, b = refs[2 * n_hidden], refs[2 * n_hidden + 1]
    o_ref[...] = jnp.dot(h, w[...], preferred_element_type=jnp.float32) + b[...]


# ---------------------------------------------------------------------------
# Parameter construction (deterministic, mirrors FC.__init__ shapes / order)
# ---------------------------------------------------------------------------
def _init_linear(key, d_in, d_out):
    """PyTorch-style uniform(-1/sqrt(fan_in), 1/sqrt(fan_in)) init, (in,out) layout."""
    kw, kb = jax.random.split(key)
    bound = 1.0 / jnp.sqrt(jnp.float32(d_in))
    w = jax.random.uniform(kw, (d_in, d_out), jnp.float32, -bound, bound)
    b = jax.random.uniform(kb, (1, d_out), jnp.float32, -bound, bound)
    return w, b


def _init_bn(key, d):
    """BatchNorm1d params; running stats folded into (scale, shift)."""
    kg, kb, km, kv = jax.random.split(key, 4)
    gamma = 1.0 + 0.1 * jax.random.normal(kg, (1, d), jnp.float32)
    beta = 0.1 * jax.random.normal(kb, (1, d), jnp.float32)
    running_mean = 0.1 * jax.random.normal(km, (1, d), jnp.float32)
    running_var = jnp.abs(1.0 + 0.1 * jax.random.normal(kv, (1, d), jnp.float32))
    scale = gamma / jnp.sqrt(running_var + BN_EPS)
    shift = beta - running_mean * scale
    return scale, shift


def build_fc_params(key, d_graph_layer, d_FC_layer, n_FC_layer, n_tasks):
    """Recreate the exact layer sequence of FC.__init__ (eval-mode parameterization).

    PyTorch quirk: for j == 0 both the `if j == 0` branch and the trailing
    `else` append a hidden block, so there are n_FC_layer hidden blocks total
    plus the head.
    """
    blocks = []   # ("block", w, b, scale, shift) or ("linear", w, b)
    for j in range(n_FC_layer):
        if j == 0:
            key, k1, k2 = jax.random.split(key, 3)
            w, b = _init_linear(k1, d_graph_layer, d_FC_layer)
            scale, shift = _init_bn(k2, d_FC_layer)
            blocks.append(("block", w, b, scale, shift))
        if j == n_FC_layer - 1:
            key, k1 = jax.random.split(key)
            w, b = _init_linear(k1, d_FC_layer, n_tasks)
            blocks.append(("linear", w, b))
        else:
            key, k1, k2 = jax.random.split(key, 3)
            w, b = _init_linear(k1, d_FC_layer, d_FC_layer)
            scale, shift = _init_bn(k2, d_FC_layer)
            blocks.append(("block", w, b, scale, shift))
    return blocks


# ---------------------------------------------------------------------------
# Host-side fold: eval-mode BatchNorm (affine) into the FOLLOWING Linear.
#   z = a*s + t ;  z @ W + b  ==  a @ (s^T ⊙ W) + (t @ W + b)
# ---------------------------------------------------------------------------
def _fold_bn_into_next(blocks):
    hidden = blocks[:-1]
    assert all(blk[0] == "block" for blk in hidden)
    assert blocks[-1][0] == "linear"
    _, w_head, b_head = blocks[-1]

    folded = []
    pending = None   # (scale, shift) of previous block's BN
    for (_, w, b, scale, shift) in hidden:
        if pending is not None:
            s, t = pending
            b = b + t @ w                 # uses the un-scaled W
            w = s.reshape(-1, 1) * w
        folded.append((w, b))
        pending = (scale, shift)
    if pending is not None:
        s, t = pending
        b_head = b_head + t @ w_head
        w_head = s.reshape(-1, 1) * w_head
    folded.append((w_head, b_head))
    return folded


# ---------------------------------------------------------------------------
# Forward pass: one fused pallas_call
# ---------------------------------------------------------------------------
def fc_forward(h, blocks):
    layers = _fold_bn_into_next(blocks)
    hidden = layers[:-1]
    w_head, b_head = layers[-1]
    n_hidden = len(hidden)

    B, d_in = h.shape
    d_mid = hidden[0][0].shape[1]
    n_tasks = w_head.shape[1]

    # Lane-dense padded dims (128-aligned works on every MXU generation).
    d_in_p = _round_up(d_in, LANE)
    d_mid_p = _round_up(d_mid, LANE)
    d_out_p = _round_up(n_tasks, LANE)

    # Batch tiling: big tile (amortize grid-step overhead), "parallel" axis.
    bm = min(MAX_BATCH_TILE, _round_up(B, SUBLANE))
    B_p = _round_up(B, bm)

    x_p = _pad2d(h.astype(jnp.float32), B_p, d_in_p)

    def resident_spec(shape):
        # Constant block index -> fetched once, stays resident across grid steps.
        return pl.BlockSpec(shape, lambda i: (0, 0))

    args = [x_p]
    in_specs = [pl.BlockSpec((bm, d_in_p), lambda i: (i, 0))]

    prev_p = d_in_p
    for (w, b) in hidden:
        wp = _pad2d(w, prev_p, d_mid_p)       # zero-padded rows/cols
        bp = _pad2d(b, 1, d_mid_p)            # zero bias in padded lanes
        args += [wp, bp]
        in_specs += [resident_spec(wp.shape), resident_spec(bp.shape)]
        prev_p = d_mid_p

    whp = _pad2d(w_head, prev_p, d_out_p)
    bhp = _pad2d(b_head, 1, d_out_p)
    args += [whp, bhp]
    in_specs += [resident_spec(whp.shape), resident_spec(bhp.shape)]

    flops = 2 * B_p * (d_in_p * d_mid_p
                       + max(n_hidden - 1, 0) * d_mid_p * d_mid_p
                       + d_mid_p * d_out_p)
    bytes_accessed = 4 * (B_p * d_in_p + B_p * d_out_p
                          + sum(int(a.size) for a in args[1:]))

    out_p = pl.pallas_call(
        functools.partial(_fused_fc_kernel, n_hidden),
        out_shape=jax.ShapeDtypeStruct((B_p, d_out_p), jnp.float32),
        grid=(B_p // bm,),
        in_specs=in_specs,
        out_specs=pl.BlockSpec((bm, d_out_p), lambda i: (i, 0)),
        compiler_params=pltpu.CompilerParams(
            dimension_semantics=("parallel",)),
        cost_estimate=pl.CostEstimate(flops=flops, transcendentals=0,
                                      bytes_accessed=bytes_accessed),
    )(*args)

    return out_p[:B, :n_tasks]


def fc_forward_ref(h, blocks):
    """Pure-jnp reference (unfolded BN, unpadded) for correctness checking."""
    for blk in blocks:
        if blk[0] == "block":
            _, w, b, scale, shift = blk
            y = h @ w + b
            y = jnp.where(y >= 0.0, y, LEAKY_SLOPE * y)
            h = y * scale + shift
        else:
            _, w, b = blk
            h = h @ w + b
    return h


# ---------------------------------------------------------------------------
if __name__ == "__main__":
    # Module hyperparameters (small, consistent with FC's forward on [B, d_graph])
    d_graph_layer = 32
    d_FC_layer = 32
    n_FC_layer = 3
    dropout = 0.1      # identity in eval mode
    n_tasks = 2
    batch = 8

    key = jax.random.PRNGKey(0)
    k_params, k_input = jax.random.split(key)

    blocks = build_fc_params(k_params, d_graph_layer, d_FC_layer, n_FC_layer, n_tasks)
    h = jax.random.normal(k_input, (batch, d_graph_layer), jnp.float32)

    out = fc_forward(h, blocks)
    out = jax.block_until_ready(out)

    ref = fc_forward_ref(h, blocks)
    assert out.shape == (batch, n_tasks), out.shape
    assert jnp.allclose(out, ref, atol=1e-4, rtol=1e-4), "mismatch vs reference"

    print("KERNEL_OK")
</pallas_src>

<mosaic_0001>
module attributes {stable_mosaic.version = 11 : i64} {
  func.func @_fused_fc_kernel(%arg0: i32, %arg1: memref<8x128xf32, #tpu.memory_space<vmem>>, %arg2: memref<128x128xf32, #tpu.memory_space<vmem>>, %arg3: memref<1x128xf32, #tpu.memory_space<vmem>>, %arg4: memref<128x128xf32, #tpu.memory_space<vmem>>, %arg5: memref<1x128xf32, #tpu.memory_space<vmem>>, %arg6: memref<128x128xf32, #tpu.memory_space<vmem>>, %arg7: memref<1x128xf32, #tpu.memory_space<vmem>>, %arg8: memref<128x128xf32, #tpu.memory_space<vmem>>, %arg9: memref<1x128xf32, #tpu.memory_space<vmem>>, %arg10: memref<8x128xf32, #tpu.memory_space<vmem>>) attributes {dimension_semantics = [#tpu.dimension_semantics<parallel>], iteration_bounds = array<i64: 1>, scalar_prefetch = 0 : i64, scratch_operands = 0 : i64, tpu.core_type = #tpu.core_type<tc>, window_params = [{transform_indices = @transform_0, window_bounds = array<i64: 8, 128>}, {pipeline_mode = #tpu.pipeline_mode<synchronous>, transform_indices = @transform_1, window_bounds = array<i64: 128, 128>}, {pipeline_mode = #tpu.pipeline_mode<synchronous>, transform_indices = @transform_2, window_bounds = array<i64: 1, 128>}, {pipeline_mode = #tpu.pipeline_mode<synchronous>, transform_indices = @transform_3, window_bounds = array<i64: 128, 128>}, {pipeline_mode = #tpu.pipeline_mode<synchronous>, transform_indices = @transform_4, window_bounds = array<i64: 1, 128>}, {pipeline_mode = #tpu.pipeline_mode<synchronous>, transform_indices = @transform_5, window_bounds = array<i64: 128, 128>}, {pipeline_mode = #tpu.pipeline_mode<synchronous>, transform_indices = @transform_6, window_bounds = array<i64: 1, 128>}, {pipeline_mode = #tpu.pipeline_mode<synchronous>, transform_indices = @transform_7, window_bounds = array<i64: 128, 128>}, {pipeline_mode = #tpu.pipeline_mode<synchronous>, transform_indices = @transform_8, window_bounds = array<i64: 1, 128>}, {transform_indices = @transform_9, window_bounds = array<i64: 8, 128>}]} {
    %c0 = arith.constant 0 : index
    %c0_0 = arith.constant 0 : index
    %0 = vector.load %arg1[%c0, %c0_0] : memref<8x128xf32, #tpu.memory_space<vmem>>, vector<8x128xf32>
    %c0_1 = arith.constant 0 : index
    %c0_2 = arith.constant 0 : index
    %1 = vector.load %arg2[%c0_1, %c0_2] : memref<128x128xf32, #tpu.memory_space<vmem>>, vector<128x128xf32>
    %cst = arith.constant dense<0.000000e+00> : vector<8x128xf32>
    %2 = tpu.matmul %0, %1, %cst {dimension_numbers = #tpu.dot_dimension_numbers<[1], [0], [0], [1], [0, 0, 1, 1], [], []>} : vector<8x128xf32>, vector<128x128xf32>, vector<8x128xf32> -> vector<8x128xf32>
    %c0_3 = arith.constant 0 : index
    %c0_4 = arith.constant 0 : index
    %3 = vector.load %arg3[%c0_3, %c0_4] : memref<1x128xf32, #tpu.memory_space<vmem>>, vector<1x128xf32>
    %4 = vector.broadcast %3 : vector<1x128xf32> to vector<8x128xf32>
    %5 = arith.addf %2, %4 : vector<8x128xf32>
    %cst_5 = arith.constant 0.00999999977 : f32
    %6 = vector.broadcast %cst_5 : f32 to vector<8x128xf32>
    %7 = arith.mulf %6, %5 : vector<8x128xf32>
    %8 = arith.maximumf %5, %7 : vector<8x128xf32>
    %c0_6 = arith.constant 0 : index
    %c0_7 = arith.constant 0 : index
    %9 = vector.load %arg4[%c0_6, %c0_7] : memref<128x128xf32, #tpu.memory_space<vmem>>, vector<128x128xf32>
    %cst_8 = arith.constant dense<0.000000e+00> : vector<8x128xf32>
    %10 = tpu.matmul %8, %9, %cst_8 {dimension_numbers = #tpu.dot_dimension_numbers<[1], [0], [0], [1], [0, 0, 1, 1], [], []>} : vector<8x128xf32>, vector<128x128xf32>, vector<8x128xf32> -> vector<8x128xf32>
    %c0_9 = arith.constant 0 : index
    %c0_10 = arith.constant 0 : index
    %11 = vector.load %arg5[%c0_9, %c0_10] : memref<1x128xf32, #tpu.memory_space<vmem>>, vector<1x128xf32>
    %12 = vector.broadcast %11 : vector<1x128xf32> to vector<8x128xf32>
    %13 = arith.addf %10, %12 : vector<8x128xf32>
    %cst_11 = arith.constant 0.00999999977 : f32
    %14 = vector.broadcast %cst_11 : f32 to vector<8x128xf32>
    %15 = arith.mulf %14, %13 : vector<8x128xf32>
    %16 = arith.maximumf %13, %15 : vector<8x128xf32>
    %c0_12 = arith.constant 0 : index
    %c0_13 = arith.constant 0 : index
    %17 = vector.load %arg6[%c0_12, %c0_13] : memref<128x128xf32, #tpu.memory_space<vmem>>, vector<128x128xf32>
    %cst_14 = arith.constant dense<0.000000e+00> : vector<8x128xf32>
    %18 = tpu.matmul %16, %17, %cst_14 {dimension_numbers = #tpu.dot_dimension_numbers<[1], [0], [0], [1], [0, 0, 1, 1], [], []>} : vector<8x128xf32>, vector<128x128xf32>, vector<8x128xf32> -> vector<8x128xf32>
    %c0_15 = arith.constant 0 : index
    %c0_16 = arith.constant 0 : index
    %19 = vector.load %arg7[%c0_15, %c0_16] : memref<1x128xf32, #tpu.memory_space<vmem>>, vector<1x128xf32>
    %20 = vector.broadcast %19 : vector<1x128xf32> to vector<8x128xf32>
    %21 = arith.addf %18, %20 : vector<8x128xf32>
    %cst_17 = arith.constant 0.00999999977 : f32
    %22 = vector.broadcast %cst_17 : f32 to vector<8x128xf32>
    %23 = arith.mulf %22, %21 : vector<8x128xf32>
    %24 = arith.maximumf %21, %23 : vector<8x128xf32>
    %c0_18 = arith.constant 0 : index
    %c0_19 = arith.constant 0 : index
    %25 = vector.load %arg8[%c0_18, %c0_19] : memref<128x128xf32, #tpu.memory_space<vmem>>, vector<128x128xf32>
    %cst_20 = arith.constant dense<0.000000e+00> : vector<8x128xf32>
    %26 = tpu.matmul %24, %25, %cst_20 {dimension_numbers = #tpu.dot_dimension_numbers<[1], [0], [0], [1], [0, 0, 1, 1], [], []>} : vector<8x128xf32>, vector<128x128xf32>, vector<8x128xf32> -> vector<8x128xf32>
    %c0_21 = arith.constant 0 : index
    %c0_22 = arith.constant 0 : index
    %27 = vector.load %arg9[%c0_21, %c0_22] : memref<1x128xf32, #tpu.memory_space<vmem>>, vector<1x128xf32>
    %28 = vector.broadcast %27 : vector<1x128xf32> to vector<8x128xf32>
    %29 = arith.addf %26, %28 : vector<8x128xf32>
    %c0_23 = arith.constant 0 : index
    %c0_24 = arith.constant 0 : index
    %30 = vector.load %arg10[%c0_23, %c0_24] : memref<8x128xf32, #tpu.memory_space<vmem>>, vector<8x128xf32>
    tpu.vector_store %arg10[%c0_23, %c0_24], %29 {strides = array<i32>} : memref<8x128xf32, #tpu.memory_space<vmem>>, vector<8x128xf32>,
    return
  }
  func.func @transform_0(%arg0: i32) -> (i32, i32) {
    %c0_i32 = arith.constant 0 : i32
    %c0_i32_0 = arith.constant 0 : i32
    return %arg0, %c0_i32 : i32, i32
  }
  func.func @transform_1(%arg0: i32) -> (i32, i32) {
    %c0_i32 = arith.constant 0 : i32
    %c0_i32_0 = arith.constant 0 : i32
    %c0_i32_1 = arith.constant 0 : i32
    return %c0_i32, %c0_i32_0 : i32, i32
  }
  func.func @transform_2(%arg0: i32) -> (i32, i32) {
    %c0_i32 = arith.constant 0 : i32
    %c0_i32_0 = arith.constant 0 : i32
    %c0_i32_1 = arith.constant 0 : i32
    return %c0_i32, %c0_i32_0 : i32, i32
  }
  func.func @transform_3(%arg0: i32) -> (i32, i32) {
    %c0_i32 = arith.constant 0 : i32
    %c0_i32_0 = arith.constant 0 : i32
    %c0_i32_1 = arith.constant 0 : i32
    return %c0_i32, %c0_i32_0 : i32, i32
  }
  func.func @transform_4(%arg0: i32) -> (i32, i32) {
    %c0_i32 = arith.constant 0 : i32
    %c0_i32_0 = arith.constant 0 : i32
    %c0_i32_1 = arith.constant 0 : i32
    return %c0_i32, %c0_i32_0 : i32, i32
  }
  func.func @transform_5(%arg0: i32) -> (i32, i32) {
    %c0_i32 = arith.constant 0 : i32
    %c0_i32_0 = arith.constant 0 : i32
    %c0_i32_1 = arith.constant 0 : i32
    return %c0_i32, %c0_i32_0 : i32, i32
  }
  func.func @transform_6(%arg0: i32) -> (i32, i32) {
    %c0_i32 = arith.constant 0 : i32
    %c0_i32_0 = arith.constant 0 : i32
    %c0_i32_1 = arith.constant 0 : i32
    return %c0_i32, %c0_i32_0 : i32, i32
  }
  func.func @transform_7(%arg0: i32) -> (i32, i32) {
    %c0_i32 = arith.constant 0 : i32
    %c0_i32_0 = arith.constant 0 : i32
    %c0_i32_1 = arith.constant 0 : i32
    return %c0_i32, %c0_i32_0 : i32, i32
  }
  func.func @transform_8(%arg0: i32) -> (i32, i32) {
    %c0_i32 = arith.constant 0 : i32
    %c0_i32_0 = arith.constant 0 : i32
    %c0_i32_1 = arith.constant 0 : i32
    return %c0_i32, %c0_i32_0 : i32, i32
  }
  func.func @transform_9(%arg0: i32) -> (i32, i32) {
    %c0_i32 = arith.constant 0 : i32
    %c0_i32_0 = arith.constant 0 : i32
    return %arg0, %c0_i32 : i32, i32
  }
}

</mosaic_0001>

<bundles_post_ra>
// kernel: tpu_custom_call.1
= control target key start
LH: loop header
LB: loop body
LE: loop exit
PB: predicated region body
PF: predicated region fallthrough
CT: control target
= control target key end

     0   :  { %14 = vsyncpa [#allocation3], 0  ;;  %s1152_s0 = inlined_call_operand.hbm [shape: f32[8,128], index: 0, kind: input, shape index: {}]   ;;  %s1153_s1 = inlined_call_operand.hbm [shape: f32[128,128], index: 1, kind: input, shape index: {}]   ;;  %s1154_s2 = inlined_call_operand.vmem [shape: f32[1,128], index: 2, kind: input, shape index: {}]   ;;  %s1155_s3 = inlined_call_operand.hbm [shape: f32[128,128], index: 3, kind: input, shape index: {}]   ;;  %s1156_s4 = inlined_call_operand.vmem [shape: f32[1,128], index: 4, kind: input, shape index: {}]   ;;  %s1157_s5 = inlined_call_operand.hbm [shape: f32[128,128], index: 5, kind: input, shape index: {}]   ;;  %s1158_s6 = inlined_call_operand.vmem [shape: f32[1,128], index: 6, kind: input, shape index: {}]   ;;  %s1159_s7 = inlined_call_operand.hbm [shape: f32[128,128], index: 7, kind: input, shape index: {}]   ;;  %s1160_s8 = inlined_call_operand.vmem [shape: f32[1,128], index: 8, kind: input, shape index: {}]   ;;  %s1161_s9 = inlined_call_operand.hbm [shape: f32[8,128], index: 9, kind: output, shape index: {}]  }
   0x1   :  { %15 = vsyncpa [#allocation6], 0 }
   0x2   :  { %16 = vsyncpa [#allocation9], 0 }
   0x3   :  { %17 = vsyncpa [#allocation4], 0  ;;  %s955_s30 = smov [#allocation5]   ;;  %s815_s13 = scalar_lea.hbm %s1153_s1, 2048 }
   0x4   :  { %s33_s10 = sshll.u32 %s955_s30, 4  ;;  %p816_p0 = scmp.ne.s32.totalorder %s1153_s1, %s815_s13  ;;  %s34_s10 = int_to_ptr.vmem [resolvable:$true] %s33_s10 }
   0x5   :  { %p819_p1 = scmp.lt.u32.totalorder %s815_s13, %s1153_s1 }
   0x7   :  { %p821_p2 = pnand %p819_p1, %p816_p0 }
   0x9   :  { %824 = shalt.err (!%p821_p2)
}
   0xa   :  { %s825_s18 = scalar_lea.vmem %s34_s10, 2048  ;;  %p830_p4 = scmp.lt.s32.totalorder %s34_s10, %s34_s10 }
   0xb   :  { %p826_p3 = scmp.ne.s32.totalorder %s34_s10, %s825_s18  ;;  %p831_p5 = scmp.lt.s32.totalorder %s825_s18, %s825_s18 }
   0xd   :  { %p832_p6 = por %p831_p5, %p830_p4 }
   0xf   :  { %p833_p7 = pnand %p832_p6, %p826_p3 }
  0x11   :  { %836 = shalt.err (!%p833_p7)
}
  0x12   :  { %s956_s19 = smov 128   ;;  %s957_s20 = smov 8  }
  0x13   :  { %39 = dma.hbm_to_vmem [thread:$0]  %s1153_s1, 2048, %s34_s10, [#allocation6], %s956_s19, %s956_s19, %s957_s20  }
  0x14   :  { %s958_s23 = smov [#allocation8]   ;;  %s959_s25 = smov [#allocation2]  }
  0x15   :  { %s61_s24 = sshll.u32 %s958_s23, 4  ;;  %s24_s26 = sshll.u32 %s959_s25, 4  ;;  %s62_s24 = int_to_ptr.vmem [resolvable:$true] %s61_s24  ;;  %s25_s26 = int_to_ptr.vmem [resolvable:$true] %s24_s26 }
  0x16   :  { %s837_s29 = scalar_lea.hbm %s1157_s5, 2048 }
  0x17   :  { %p838_p8 = scmp.ne.s32.totalorder %s1157_s5, %s837_s29  ;;  %p841_p9 = scmp.lt.u32.totalorder %s837_s29, %s1157_s5 }
  0x19   :  { %p843_p10 = pnand %p841_p9, %p838_p8 }
  0x1b   :  { %846 = shalt.err (!%p843_p10)
}
  0x1c   :  { %s847_s1 = scalar_lea.vmem %s62_s24, 2048  ;;  %p852_p12 = scmp.lt.s32.totalorder %s62_s24, %s62_s24 }
  0x1d   :  { %p848_p11 = scmp.ne.s32.totalorder %s62_s24, %s847_s1  ;;  %p853_p13 = scmp.lt.s32.totalorder %s847_s1, %s847_s1 }
  0x1f   :  { %p854_p0 = por %p853_p13, %p852_p12 }
  0x21   :  { %p855_p1 = pnand %p854_p0, %p848_p11 }
  0x23   :  { %858 = shalt.err (!%p855_p1)
}
  0x24   :  { %67 = dma.hbm_to_vmem [thread:$0]  %s1157_s5, 2048, %s62_s24, [#allocation9], %s956_s19, %s956_s19, %s957_s20  }
  0x25   :  { %s859_s17 = scalar_lea.hbm %s1152_s0, 128 }
  0x26   :  { %p860_p2 = scmp.ne.s32.totalorder %s1152_s0, %s859_s17  ;;  %p863_p3 = scmp.lt.u32.totalorder %s859_s17, %s1152_s0 }
  0x28   :  { %p865_p4 = pnand %p863_p3, %p860_p2 }
  0x2a   :  { %868 = shalt.err (!%p865_p4)
}
  0x2b   :  { %s869_s25 = scalar_lea.vmem %s25_s26, 128  ;;  %p874_p6 = scmp.lt.s32.totalorder %s25_s26, %s25_s26 }
  0x2c   :  { %p870_p5 = scmp.ne.s32.totalorder %s25_s26, %s869_s25  ;;  %p875_p7 = scmp.lt.s32.totalorder %s869_s25, %s869_s25 }
  0x2e   :  { %p876_p8 = por %p875_p7, %p874_p6 }
  0x30   :  { %p877_p9 = pnand %p876_p8, %p870_p5 }
  0x32   :  { %880 = shalt.err (!%p877_p9)
}
  0x33   :  { %27 = dma.hbm_to_vmem [thread:$0]  %s1152_s0, 128, %s25_s26, [#allocation3]  }
  0x34   :  { %s960_s27 = smov [#allocation7]   ;;  %s961_s29 = smov [#allocation10]  }
  0x35   :  { %s47_s28 = sshll.u32 %s960_s27, 4  ;;  %s75_s30 = sshll.u32 %s961_s29, 4  ;;  %s48_s28 = int_to_ptr.vmem [resolvable:$true] %s47_s28  ;;  %s76_s30 = int_to_ptr.vmem [resolvable:$true] %s75_s30 }
  0x36   :  { %s881_s13 = scalar_lea.hbm %s1155_s3, 2048 }
  0x37   :  { %p882_p10 = scmp.ne.s32.totalorder %s1155_s3, %s881_s13  ;;  %p885_p11 = scmp.lt.u32.totalorder %s881_s13, %s1155_s3 }
  0x39   :  { %p887_p12 = pnand %p885_p11, %p882_p10 }
  0x3b   :  { %890 = shalt.err (!%p887_p12)
}
  0x3c   :  { %s891_s0 = scalar_lea.vmem %s48_s28, 2048  ;;  %p896_p0 = scmp.lt.s32.totalorder %s48_s28, %s48_s28 }
  0x3d   :  { %p892_p13 = scmp.ne.s32.totalorder %s48_s28, %s891_s0  ;;  %p897_p1 = scmp.lt.s32.totalorder %s891_s0, %s891_s0 }
  0x3f   :  { %p898_p2 = por %p897_p1, %p896_p0 }
  0x41   :  { %p899_p3 = pnand %p898_p2, %p892_p13 }
  0x43   :  { %902 = shalt.err (!%p899_p3)
}
  0x44   :  { %53 = dma.hbm_to_vmem [thread:$0]  %s1155_s3, 2048, %s48_s28, [#allocation6], %s956_s19, %s956_s19, %s957_s20  }
  0x45   :  { %s903_s21 = scalar_lea.hbm %s1159_s7, 2048 }
  0x46   :  { %p904_p4 = scmp.ne.s32.totalorder %s1159_s7, %s903_s21  ;;  %p907_p5 = scmp.lt.u32.totalorder %s903_s21, %s1159_s7 }
  0x48   :  { %p909_p6 = pnand %p907_p5, %p904_p4 }
  0x4a   :  { %912 = shalt.err (!%p909_p6)
}
  0x4b   :  { %s913_s24 = scalar_lea.vmem %s76_s30, 2048  ;;  %p918_p8 = scmp.lt.s32.totalorder %s76_s30, %s76_s30 }
  0x4c   :  { %p914_p7 = scmp.ne.s32.totalorder %s76_s30, %s913_s24  ;;  %p919_p9 = scmp.lt.s32.totalorder %s913_s24, %s913_s24 }
  0x4e   :  { %p920_p10 = por %p919_p9, %p918_p8 }
  0x50   :  { %p921_p11 = pnand %p920_p10, %p914_p7 }
  0x52   :  { %924 = shalt.err (!%p921_p11)
}
  0x53   :  { %81 = dma.hbm_to_vmem [thread:$0]  %s1159_s7, 2048, %s76_s30, [#allocation9], %s956_s19, %s956_s19, %s957_s20  }
  0x54   :  { %947 = dma.done.wait [#allocation3], 128  }
  0x55   :  { %948 = vsyncadd [#allocation3], 4294967168 }
  0x56   :  { %949 = dma.done.wait [#allocation6], 4096  }
  0x57   :  { %950 = vsyncadd [#allocation6], 4294963200 }
  0x58   :  { %951 = dma.done.wait [#allocation9], 4096  }
  0x59   :  { %952 = vsyncadd [#allocation9], 4294963200  ;;  %v962_v0 = vmov 0.0|0.0   ;;  %vm963_vm0 = vmmov 0   ;;  %v964_v1 = vmov 0.0   ;;  %v100_v2 = vld [vmem:[#allocation5] sm:$0xff] }
  0x5a   :  { %708 = vmatprep.subr.bf16.mxu0 %v962_v0  ;;  %600 = vmatprep.mubr.msk.f32.mxu0 %vm963_vm0, %v964_v1  ;;  %v101_v3 = vld [vmem:[#allocation5 + $0x8] sm:$0xff]  ;;  %v102_v4 = vld [vmem:[#allocation5 + $0x10] sm:$0xff]  ;;  %v103_v6 = vld [vmem:[#allocation5 + $0x18] sm:$0xff]  ;;  %s965_s11 = smov [#allocation11]  }
  0x5b   :  { %732 = vmatprep.subr.bf16.mxu1 %v962_v0  ;;  %635 = vmatprep.mubr.msk.f32.mxu1 %vm963_vm0, %v964_v1  ;;  %v709_v5 = vpack.c.bf16 %v101_v3, %v100_v2  ;;  %v712_v7 = vpack.c.bf16 %v103_v6, %v102_v4  ;;  %v104_v8 = vld [vmem:[#allocation5 + $0x20] sm:$0xff]  ;;  %v105_v9 = vld [vmem:[#allocation5 + $0x28] sm:$0xff]  ;;  %v197_v12 = vld [vmem:[#allocation7 + $0x10] sm:$0xff]  ;;  %s485_s12 = sshll.u32 %s965_s11, 4  ;;  %s486_s12 = int_to_ptr.vmem [resolvable:$true] %s485_s12 }
  0x5c   :  { %v195_v10 = vld [vmem:[#allocation7] sm:$0xff]  ;;  %v196_v11 = vld [vmem:[#allocation7 + $0x8] sm:$0xff]  ;;  %v198_v13 = vld [vmem:[#allocation7 + $0x18] sm:$0xff]  ;;  %v715_v14 = vpack.c.bf16 %v105_v9, %v104_v8  ;;  %s925_s13 = scalar_lea.vmem %s486_s12, 128  ;;  %p930_p13 = scmp.lt.s32.totalorder %s486_s12, %s486_s12 }
  0x5d   :  { %710 = vmatpush3.bf16.msra.mxu0 %v709_v5  ;;  %v733_v15 = vpack.c.bf16 %v196_v11, %v195_v10  ;;  %v106_v16 = vld [vmem:[#allocation5 + $0x30] sm:$0xff]  ;;  %v107_v17 = vld [vmem:[#allocation5 + $0x38] sm:$0xff]  ;;  %v736_v18 = vpack.c.bf16 %v198_v13, %v197_v12  ;;  %v199_v19 = vld [vmem:[#allocation7 + $0x20] sm:$0xff]  ;;  %p926_p12 = scmp.ne.s32.totalorder %s486_s12, %s925_s13  ;;  %p931_p0 = scmp.lt.s32.totalorder %s925_s13, %s925_s13 }
  0x5e   :  { %711 = vmatprep.subr.bf16.mxu0 %v962_v0  ;;  %v200_v20 = vld [vmem:[#allocation7 + $0x28] sm:$0xff]  ;;  %v718_v21 = vpack.c.bf16 %v107_v17, %v106_v16  ;;  %v108_v22 = vld [vmem:[#allocation5 + $0x40] sm:$0xff]  ;;  %v201_v25 = vld [vmem:[#allocation7 + $0x30] sm:$0xff] }
  0x5f   :  { %734 = vmatpush3.bf16.msra.mxu1 %v733_v15  ;;  %v109_v23 = vld [vmem:[#allocation5 + $0x48] sm:$0xff]  ;;  %v739_v24 = vpack.c.bf16 %v200_v20, %v199_v19  ;;  %v202_v26 = vld [vmem:[#allocation7 + $0x38] sm:$0xff]  ;;  %v110_v28 = vld [vmem:[#allocation5 + $0x50] sm:$0xff]  ;;  %p932_p1 = por %p931_p0, %p930_p13 }
  0x60   :  { %735 = vmatprep.subr.bf16.mxu1 %v962_v0  ;;  %v721_v27 = vpack.c.bf16 %v109_v23, %v108_v22  ;;  %v111_v29 = vld [vmem:[#allocation5 + $0x58] sm:$0xff]  ;;  %v742_v30 = vpack.c.bf16 %v202_v26, %v201_v25  ;;  %v203_v31 = vld [vmem:[#allocation7 + $0x40] sm:$0xff]  ;;  %v204_v32 = vld [vmem:[#allocation7 + $0x48] sm:$0xff] }
  0x61   :  { %713 = vmatpush3.bf16.msra.mxu0 %v712_v7  ;;  %v724_v33 = vpack.c.bf16 %v111_v29, %v110_v28  ;;  %v112_v34 = vld [vmem:[#allocation5 + $0x60] sm:$0xff]  ;;  %v113_v35 = vld [vmem:[#allocation5 + $0x68] sm:$0xff]  ;;  %v745_v36 = vpack.c.bf16 %v204_v32, %v203_v31  ;;  %v205_v37 = vld [vmem:[#allocation7 + $0x50] sm:$0xff]  ;;  %p933_p2 = pnand %p932_p1, %p926_p12 }
  0x62   :  { %714 = vmatprep.subr.bf16.mxu0 %v962_v0  ;;  %v206_v38 = vld [vmem:[#allocation7 + $0x58] sm:$0xff]  ;;  %v727_v39 = vpack.c.bf16 %v113_v35, %v112_v34  ;;  %v114_v40 = vld [vmem:[#allocation5 + $0x70] sm:$0xff]  ;;  %v207_v45 = vld [vmem:[#allocation7 + $0x60] sm:$0xff] }
  0x63   :  { %737 = vmatpush3.bf16.msra.mxu1 %v736_v18  ;;  %v115_v41 = vld [vmem:[#allocation5 + $0x78] sm:$0xff]  ;;  %v748_v42 = vpack.c.bf16 %v206_v38, %v205_v37  ;;  %v208_v46 = vld [vmem:[#allocation7 + $0x68] sm:$0xff]  ;;  %v209_v48 = vld [vmem:[#allocation7 + $0x70] sm:$0xff] }
  0x64   :  { %738 = vmatprep.subr.bf16.mxu1 %v962_v0  ;;  %v730_v43 = vpack.c.bf16 %v115_v41, %v114_v40  ;;  %v99_v44 = vld [vmem:[#allocation2] sm:$0xff]  ;;  %v751_v47 = vpack.c.bf16 %v208_v46, %v207_v45  ;;  %v290_v51 = vld [vmem:[#allocation8] sm:$0xff]  ;;  %v291_v52 = vld [vmem:[#allocation8 + $0x8] sm:$0xff] }
  0x65   :  { %716 = vmatpush3.bf16.msra.mxu0 %v715_v14  ;;  %v210_v49 = vld [vmem:[#allocation7 + $0x78] sm:$0xff]  ;;  %v292_v53 = vld [vmem:[#allocation8 + $0x10] sm:$0xff]  ;;  %v757_v54 = vpack.c.bf16 %v291_v52, %v290_v51  ;;  %v294_v57 = vld [vmem:[#allocation8 + $0x20] sm:$0xff] }
  0x66   :  { %717 = vmatprep.subr.bf16.mxu0 %v962_v0  ;;  %v754_v50 = vpack.c.bf16 %v210_v49, %v209_v48  ;;  %v293_v55 = vld [vmem:[#allocation8 + $0x18] sm:$0xff]  ;;  %v295_v58 = vld [vmem:[#allocation8 + $0x28] sm:$0xff]  ;;  %v296_v60 = vld [vmem:[#allocation8 + $0x30] sm:$0xff] }
  0x67   :  { %740 = vmatpush3.bf16.msra.mxu1 %v739_v24  ;;  %v760_v56 = vpack.c.bf16 %v293_v55, %v292_v53  ;;  %v763_v59 = vpack.c.bf16 %v295_v58, %v294_v57  ;;  %v297_v61 = vld [vmem:[#allocation8 + $0x38] sm:$0xff]  ;;  %v298_v63 = vld [vmem:[#allocation8 + $0x40] sm:$0xff]  ;;  %v299_v2 = vld [vmem:[#allocation8 + $0x48] sm:$0xff] }
  0x68   :  { %741 = vmatprep.subr.bf16.mxu1 %v962_v0  ;;  %v766_v62 = vpack.c.bf16 %v297_v61, %v296_v60  ;;  %v769_v3 = vpack.c.bf16 %v299_v2, %v298_v63  ;;  %v300_v4 = vld [vmem:[#allocation8 + $0x50] sm:$0xff]  ;;  %v301_v5 = vld [vmem:[#allocation8 + $0x58] sm:$0xff]  ;;  %v302_v13 = vld [vmem:[#allocation8 + $0x60] sm:$0xff] }
  0x69   :  { %719 = vmatpush3.bf16.msra.mxu0 %v718_v21  ;;  %v772_v6 = vpack.c.bf16 %v301_v5, %v300_v4  ;;  %v496_v7 = vld [vmem:[%s1154_s2] ss:$0 sm:$0xff]  ;;  %v303_v14 = vld [vmem:[#allocation8 + $0x68] sm:$0xff]  ;;  %v304_v16 = vld [vmem:[#allocation8 + $0x70] sm:$0xff] }
  0x6a   :  { %720 = vmatprep.subr.bf16.mxu0 %v962_v0  ;;  %v775_v15 = vpack.c.bf16 %v303_v14, %v302_v13  ;;  %v305_v17 = vld [vmem:[#allocation8 + $0x78] sm:$0xff]  ;;  %v385_v19 = vld [vmem:[#allocation10] sm:$0xff]  ;;  %v386_v20 = vld [vmem:[#allocation10 + $0x8] sm:$0xff] }
  0x6b   :  { %743 = vmatpush3.bf16.msra.mxu1 %v742_v30  ;;  %v778_v18 = vpack.c.bf16 %v305_v17, %v304_v16  ;;  %v387_v21 = vld [vmem:[#allocation10 + $0x10] sm:$0xff]  ;;  %v781_v22 = vpack.c.bf16 %v386_v20, %v385_v19  ;;  %v388_v23 = vld [vmem:[#allocation10 + $0x18] sm:$0xff]  ;;  %v390_v25 = vld [vmem:[#allocation10 + $0x28] sm:$0xff] }
  0x6c   :  { %744 = vmatprep.subr.bf16.mxu1 %v962_v0  ;;  %v784_v24 = vpack.c.bf16 %v388_v23, %v387_v21  ;;  %v392_v28 = vld [vmem:[#allocation10 + $0x38] sm:$0xff]  ;;  %v393_v30 = vld [vmem:[#allocation10 + $0x40] sm:$0xff]  ;;  %v394_v31 = vld [vmem:[#allocation10 + $0x48] sm:$0xff] }
  0x6d   :  { %722 = vmatpush3.bf16.msra.mxu0 %v721_v27  ;;  %v391_v27 = vld [vmem:[#allocation10 + $0x30] sm:$0xff]  ;;  %v793_v32 = vpack.c.bf16 %v394_v31, %v393_v30  ;;  %v396_v34 = vld [vmem:[#allocation10 + $0x58] sm:$0xff] }
  0x6e   :  { %723 = vmatprep.subr.bf16.mxu0 %v962_v0  ;;  %v790_v29 = vpack.c.bf16 %v392_v28, %v391_v27  ;;  %v399_v45 = vld [vmem:[#allocation10 + $0x70] sm:$0xff]  ;;  %v400_v46 = vld [vmem:[#allocation10 + $0x78] sm:$0xff] }
  0x6f   :  { %746 = vmatpush3.bf16.msra.mxu1 %v745_v36  ;;  %v497_v36 = vld [vmem:[%s1156_s4] ss:$0 sm:$0xff] }
  0x70   :  { %747 = vmatprep.subr.bf16.mxu1 %v962_v0  ;;  %v498_v48 = vld [vmem:[%s1158_s6] ss:$0 sm:$0xff] }
  0x71   :  { %725 = vmatpush3.bf16.msra.mxu0 %v724_v33  ;;  %v395_v33 = vld [vmem:[#allocation10 + $0x50] sm:$0xff] }
  0x72   :  { %726 = vmatprep.subr.bf16.mxu0 %v962_v0  ;;  %v796_v35 = vpack.c.bf16 %v396_v34, %v395_v33 }
  0x73   :  { %749 = vmatpush3.bf16.msra.mxu1 %v748_v42  ;;  %v397_v42 = vld [vmem:[#allocation10 + $0x60] sm:$0xff] }
  0x74   :  { %750 = vmatprep.subr.bf16.mxu1 %v962_v0 }
  0x75   :  { %728 = vmatpush3.bf16.msra.mxu0 %v727_v39 }
  0x76   :  { %729 = vmatprep.subr.bf16.mxu0 %v962_v0 }
  0x77   :  { %752 = vmatpush3.bf16.msra.mxu1 %v751_v47  ;;  %v802_v47 = vpack.c.bf16 %v400_v46, %v399_v45 }
  0x78   :  { %753 = vmatprep.subr.bf16.mxu1 %v962_v0 }
  0x79   :  { %731 = vmatpush3.bf16.msra.mxu0 %v730_v43  ;;  %v398_v43 = vld [vmem:[#allocation10 + $0x68] sm:$0xff] }
  0x7a   :  { %756 = vmatprep.subr.bf16.mxu0 %v962_v0 }
  0x7b   :  { %755 = vmatpush3.bf16.msra.mxu1 %v754_v50 }
  0x7c   :  { %601 = vmatmul.mubr.f32.vlgmr.msra.gmra.mrb[0].mxu0 %v99_v44  ;;  %780 = vmatprep.subr.bf16.mxu1 %v962_v0  ;;  %v799_v44 = vpack.c.bf16 %v398_v43, %v397_v42 }
  0x7d   :  { %670 = vmatprep.mubr.msk.f32.mxu0 %vm963_vm0, %v964_v1  ;;  %758 = vmatpush3.bf16.msra.mxu0 %v757_v54  ;;  %v499_v54 = vld [vmem:[%s1160_s8] ss:$0 sm:$0xff] }
  0x7e   :  { %759 = vmatprep.subr.bf16.mxu0 %v962_v0 }
  0x81   :  { %761 = vmatpush3.bf16.msra.mxu0 %v760_v56 }
  0x82   :  { %762 = vmatprep.subr.bf16.mxu0 %v962_v0 }
  0x85   :  { %764 = vmatpush3.bf16.msra.mxu0 %v763_v59 }
  0x86   :  { %765 = vmatprep.subr.bf16.mxu0 %v962_v0 }
  0x89   :  { %767 = vmatpush3.bf16.msra.mxu0 %v766_v62 }
  0x8a   :  { %768 = vmatprep.subr.bf16.mxu0 %v962_v0 }
  0x8d   :  { %770 = vmatpush3.bf16.msra.mxu0 %v769_v3 }
  0x8e   :  { %771 = vmatprep.subr.bf16.mxu0 %v962_v0 }
  0x91   :  { %773 = vmatpush3.bf16.msra.mxu0 %v772_v6 }
  0x92   :  { %774 = vmatprep.subr.bf16.mxu0 %v962_v0 }
  0x95   :  { %776 = vmatpush3.bf16.msra.mxu0 %v775_v15 }
  0x96   :  { %777 = vmatprep.subr.bf16.mxu0 %v962_v0 }
  0x99   :  { %779 = vmatpush3.bf16.msra.mxu0 %v778_v18 }
 0x14f   :  { %v189_v8 = vpop.f32.mrb[0].mxu0 }
 0x150   :  { %v190_v9 = vadd.f32 %v496_v7, %v189_v8  ;;  %v602_v10 = vpop.f32.mrb[1].mxu0 }
 0x152   :  { %v193_v11 = vmul.f32 0.01, %v190_v9 }
 0x154   :  { %v194_v12 = vmax.f32 %v190_v9, %v193_v11 }
 0x156   :  { %636 = vmatmul.mubr.f32.vlgmr.msra.gmra.mrb[0].mxu1 %v194_v12 }
 0x157   :  { %705 = vmatprep.mubr.msk.f32.mxu1 %vm963_vm0, %v964_v1  ;;  %782 = vmatpush3.bf16.msra.mxu1 %v781_v22  ;;  %v389_v1 = vld [vmem:[#allocation10 + $0x20] sm:$0xff] }
 0x158   :  { %783 = vmatprep.subr.bf16.mxu1 %v962_v0  ;;  %v787_v26 = vpack.c.bf16 %v390_v25, %v389_v1 }
 0x15b   :  { %785 = vmatpush3.bf16.msra.mxu1 %v784_v24 }
 0x15c   :  { %786 = vmatprep.subr.bf16.mxu1 %v962_v0 }
 0x15f   :  { %788 = vmatpush3.bf16.msra.mxu1 %v787_v26 }
 0x160   :  { %789 = vmatprep.subr.bf16.mxu1 %v962_v0 }
 0x163   :  { %791 = vmatpush3.bf16.msra.mxu1 %v790_v29 }
 0x164   :  { %792 = vmatprep.subr.bf16.mxu1 %v962_v0 }
 0x167   :  { %794 = vmatpush3.bf16.msra.mxu1 %v793_v32 }
 0x168   :  { %795 = vmatprep.subr.bf16.mxu1 %v962_v0 }
 0x16b   :  { %797 = vmatpush3.bf16.msra.mxu1 %v796_v35 }
 0x16c   :  { %798 = vmatprep.subr.bf16.mxu1 %v962_v0 }
 0x16f   :  { %800 = vmatpush3.bf16.msra.mxu1 %v799_v44 }
 0x170   :  { %801 = vmatprep.subr.bf16.mxu1 %v962_v0 }
 0x173   :  { %803 = vmatpush3.bf16.msra.mxu1 %v802_v47 }
 0x229   :  { %v284_v37 = vpop.f32.mrb[0].mxu1 }
 0x22a   :  { %v285_v38 = vadd.f32 %v497_v36, %v284_v37  ;;  %v637_v39 = vpop.f32.mrb[1].mxu1 }
 0x22c   :  { %v288_v40 = vmul.f32 0.01, %v285_v38 }
 0x22e   :  { %v289_v41 = vmax.f32 %v285_v38, %v288_v40 }
 0x230   :  { %671 = vmatmul.mubr.f32.vlgmr.msra.gmra.mrb[2].mxu0 %v289_v41 }
 0x303   :  { %v379_v49 = vpop.f32.mrb[2].mxu0 }
 0x304   :  { %v380_v50 = vadd.f32 %v498_v48, %v379_v49  ;;  %v672_v51 = vpop.f32.mrb[3].mxu0 }
 0x306   :  { %v383_v52 = vmul.f32 0.01, %v380_v50 }
 0x308   :  { %v384_v53 = vmax.f32 %v380_v50, %v383_v52 }
 0x30a   :  { %706 = vmatmul.mubr.f32.vlgmr.msra.gmra.mrb[2].mxu1 %v384_v53 }
 0x3dd   :  { %v474_v0 = vpop.f32.mrb[2].mxu1 }
 0x3de   :  { %v475_v55 = vadd.f32 %v499_v54, %v474_v0  ;;  %v707_v56 = vpop.f32.mrb[3].mxu1 }
 0x3e0   :  { %478 = vst [vmem:[#allocation11] sm:$0xff] %v475_v55 }
 0x3e1   :  { %936 = shalt.err (!%p933_p2)
}
 0x3e2   :  { %s937_s10 = scalar_lea.hbm %s1161_s9, 128 }
 0x3e3   :  { %p938_p3 = scmp.ne.s32.totalorder %s1161_s9, %s937_s10  ;;  %p941_p4 = scmp.lt.u32.totalorder %s937_s10, %s1161_s9 }
 0x3e5   :  { %p943_p5 = pnand %p941_p4, %p938_p3 }
 0x3e7   :  { %946 = shalt.err (!%p943_p5)
}
 0x3e8   :  { %488 = dma.vmem_to_hbm [thread:$0]  %s486_s12, 128, %s1161_s9, [#allocation4]  }
 0x3e9   :  { %953 = dma.done.wait [#allocation4], 128  }
 0x3ea   :  { %954 = vsyncadd [#allocation4], 4294967168 }
 0x3eb   :  { %492 = vsyncpa [#allocation3], 1 }
 0x3ec   :  { %493 = vsyncpa [#allocation6], 1 }
 0x3ed   :  { %494 = vsyncpa [#allocation9], 1 }
 0x3ee   :  { %495 = vsyncpa [#allocation4], 1 }

</bundles_post_ra>
